<compile_context>
chip_gen: v7x
topology: tpu7x:2x2x1
jax: 0.10.0
libtpu: 0.0.40
codegen_flags: <defaults>
</compile_context>

<pallas_src>
import numpy as np
import jax
import jax.numpy as jnp
from jax.experimental import pallas as pl
from jax.experimental.pallas import tpu as pltpu


# ---------------------------------------------------------------------------
# Kernel: Gb graphs per grid step, packed into one (M=Gb*Np, Dp) feature slab.
# A is the (M, M) block-diagonal, pre-normalized propagation matrix (bf16).
# ---------------------------------------------------------------------------
def _hypergraph_afc_kernel(x_ref, a_ref, wt1_ref, b1_ref, wt2_ref, b2_ref,
                           alpha_ref, o_ref):
    x = x_ref[...]                       # (M, Dp) f32 — kept f32 for the residual
    a = a_ref[...]                       # (M, M)  bf16 block-diag D^-1 H B^-1 H^T
    alpha = alpha_ref[0]                 # PReLU negative slope (SMEM scalar)

    def hconv(feat_bf16, wt_ref, b_ref):
        # feat @ W^T : weights pre-transposed on the host, bf16 MXU, f32 acc
        xw = jnp.dot(feat_bf16, wt_ref[...], preferred_element_type=jnp.float32)
        # fused node->edge->node propagation with both degree normalizations
        y = jnp.dot(a, xw.astype(jnp.bfloat16), preferred_element_type=jnp.float32)
        return y + b_ref[...]

    def prelu(v):                        # f32 elementwise on the VPU
        return jnp.where(v >= 0, v, alpha * v)

    out1 = prelu(hconv(x.astype(jnp.bfloat16), wt1_ref, b1_ref))   # layer1 + act
    out2 = hconv(out1.astype(jnp.bfloat16), wt2_ref, b2_ref) + x   # layer2 + residual
    o_ref[...] = prelu(out2).astype(o_ref.dtype)                   # final activation


def _choose_graphs_per_step(batch, np_nodes, target_rows=256):
    """Pick Gb so Gb*Np ~ 128-256 MXU rows while keeping >=2 grid steps (v7x)."""
    gb = max(1, min(batch, target_rows // np_nodes))
    if batch >= 2:
        gb = min(gb, max(1, batch // 2))
    return gb


# ---------------------------------------------------------------------------
# Wrapper.
#   x : [B, N, Dh] f32      A : [N, N] shared propagation matrix (f32)
#   w : [Dh, Dh] (PyTorch [out, in])    b : [Dh]    prelu_alpha : float
# ---------------------------------------------------------------------------
def hypergraph_structural_layer_afc(x, A, w1, b1, w2, b2, prelu_alpha):
    B, N, Dh = x.shape
    Np = -(-N // 8) * 8                  # sublane-align node axis
    Dp = -(-Dh // 128) * 128             # lane-dense feature axis
    Gb = _choose_graphs_per_step(B, Np)  # graphs packed per grid step
    G = -(-B // Gb)                      # grid steps
    Bp = G * Gb
    M = Gb * Np                          # rows per grid step

    # ---- host-side packing ----
    x_p = jnp.pad(jnp.asarray(x, jnp.float32),
                  ((0, Bp - B), (0, Np - N), (0, Dp - Dh)))
    x_g = x_p.reshape(G, M, Dp)          # Gb consecutive graphs per slab

    A_np = np.asarray(A, np.float32)
    A_bd = np.zeros((M, M), np.float32)  # block-diagonal, padded rows/cols = 0
    for g in range(Gb):
        A_bd[g * Np: g * Np + N, g * Np: g * Np + N] = A_np
    A_bd = jnp.asarray(A_bd, jnp.bfloat16)

    def _prep_w(w):
        wt = jnp.asarray(w, jnp.float32).T                       # [in, out]
        return jnp.pad(wt, ((0, Dp - Dh), (0, Dp - Dh))).astype(jnp.bfloat16)

    wt1, wt2 = _prep_w(w1), _prep_w(w2)
    b1p = jnp.pad(jnp.asarray(b1, jnp.float32).reshape(1, -1), ((0, 0), (0, Dp - Dh)))
    b2p = jnp.pad(jnp.asarray(b2, jnp.float32).reshape(1, -1), ((0, 0), (0, Dp - Dh)))
    alpha = jnp.asarray([prelu_alpha], jnp.float32)

    out = pl.pallas_call(
        _hypergraph_afc_kernel,
        out_shape=jax.ShapeDtypeStruct((G, M, Dp), jnp.float32),
        grid=(G,),
        in_specs=[
            pl.BlockSpec((None, M, Dp), lambda g: (g, 0, 0)),      # x (Gb graphs/step)
            pl.BlockSpec((M, M), lambda g: (0, 0)),                # block-diag A (shared)
            pl.BlockSpec((Dp, Dp), lambda g: (0, 0)),              # W1^T (shared)
            pl.BlockSpec((1, Dp), lambda g: (0, 0)),               # b1   (shared)
            pl.BlockSpec((Dp, Dp), lambda g: (0, 0)),              # W2^T (shared)
            pl.BlockSpec((1, Dp), lambda g: (0, 0)),               # b2   (shared)
            pl.BlockSpec(memory_space=pltpu.MemorySpace.SMEM),     # PReLU alpha
        ],
        out_specs=pl.BlockSpec((None, M, Dp), lambda g: (g, 0, 0)),
        compiler_params=pltpu.CompilerParams(
            dimension_semantics=("parallel",),        # batch groups -> 2 TCs on v7x
            vmem_limit_bytes=32 * 1024 * 1024,
        ),
    )(x_g, A_bd, wt1, b1p, wt2, b2p, alpha)

    return out.reshape(Bp, Np, Dp)[:B, :N, :Dh]


# ---------------------------------------------------------------------------
# Host-side (static per graph): build incidence and fold BOTH degree
# normalizations into one dense propagation matrix  A = D^-1 H B^-1 H^T.
# ---------------------------------------------------------------------------
def build_normalized_propagation(edge_index, num_nodes):
    # TODO(synk): networkx asyn_fluidc community detection is a stochastic,
    # host-side graph algorithm with no Pallas equivalent; use a deterministic
    # contiguous partition into k = min(3, N) communities instead (same
    # downstream semantics: all intra-community node pairs become incidences).
    del edge_index  # only consumed by the (replaced) community detection step
    k = min(3, num_nodes)
    partition = {n: min(n * k // num_nodes, k - 1) for n in range(num_nodes)}
    communities = {}
    for node, cid in partition.items():
        communities.setdefault(cid, []).append(node)
    pairs = []
    for nodes in communities.values():
        if len(nodes) > 1:
            for i in range(len(nodes)):
                for j in range(i + 1, len(nodes)):
                    pairs.append((nodes[i], nodes[j]))
    if not pairs:
        for i in range(num_nodes):
            for j in range(i + 1, num_nodes):
                pairs.append((i, j))

    # The reference module (ab)uses the 2nd node of each pair as the hyperedge id;
    # dense incidence H[node, hyperedge_id], hyperedge axis padded to N (all-zero
    # columns get B^-1 = 0, contributing nothing).
    H = np.zeros((num_nodes, num_nodes), dtype=np.float64)
    for a, b in pairs:
        H[a, b] += 1.0

    deg_n = H.sum(axis=1)   # node degree D
    deg_e = H.sum(axis=0)   # hyperedge degree B
    d_inv = np.divide(1.0, deg_n, out=np.zeros_like(deg_n), where=deg_n > 0)
    b_inv = np.divide(1.0, deg_e, out=np.zeros_like(deg_e), where=deg_e > 0)
    A = (d_inv[:, None] * H) @ (b_inv[:, None] * H.T)
    return A.astype(np.float32)


# ---------------------------------------------------------------------------
# Reference: f64 numpy, quantized to bf16 exactly where the kernel feeds the MXU.
# ---------------------------------------------------------------------------
def _bf16(v):
    return np.asarray(
        jnp.asarray(np.asarray(v, np.float32), jnp.bfloat16).astype(jnp.float32),
        np.float64)


def _reference_forward(x, A, w1, b1, w2, b2, alpha):
    xq, Aq = _bf16(x), _bf16(A)
    w1q, w2q = _bf16(np.asarray(w1).T), _bf16(np.asarray(w2).T)
    b1f, b2f = np.asarray(b1, np.float64), np.asarray(b2, np.float64)

    def conv(feat_q, wq, b):
        xw = feat_q @ wq
        return Aq @ _bf16(xw) + b

    def prelu(v):
        return np.where(v >= 0, v, alpha * v)

    o1 = prelu(conv(xq, w1q, b1f))
    o2 = conv(_bf16(o1), w2q, b2f) + np.asarray(x, np.float64)   # f32 residual is exact
    return prelu(o2)


if __name__ == "__main__":
    key = jax.random.PRNGKey(0)
    B, N, hidden_dim, n_heads = 16, 16, 32, 4
    out_dim = n_heads * hidden_dim // n_heads  # == hidden_dim

    k1, k2, k3 = jax.random.split(key, 3)
    # Batch of B graphs (shared structure, different features) in ONE pallas_call.
    x = jax.random.normal(k1, (B, N, hidden_dim), jnp.float32)

    # Simple deterministic ring graph as the input edge_index [2, E].
    src = np.arange(N)
    dst = (np.arange(N) + 1) % N
    edge_index = np.stack([src, dst], axis=0)
    A = build_normalized_propagation(edge_index, N)               # (N, N) f32, shared

    # Deterministic parameter init (kaiming-normal-style weights, zero bias,
    # PReLU slope 0.25 as in nn.PReLU default).
    w1 = jax.random.normal(k2, (out_dim, hidden_dim), jnp.float32) * np.sqrt(2.0 / hidden_dim)
    w2 = jax.random.normal(k3, (out_dim, hidden_dim), jnp.float32) * np.sqrt(2.0 / hidden_dim)
    b1 = jnp.zeros((out_dim,), jnp.float32)
    b2 = jnp.zeros((out_dim,), jnp.float32)
    prelu_alpha = 0.25

    out = hypergraph_structural_layer_afc(x, A, w1, b1, w2, b2, prelu_alpha)
    out = jax.block_until_ready(out)

    ref = _reference_forward(np.asarray(x), A, np.asarray(w1), np.asarray(b1),
                             np.asarray(w2), np.asarray(b2), prelu_alpha)
    assert out.shape == (B, N, hidden_dim) and out.dtype == jnp.float32
    assert np.allclose(np.asarray(out), ref, rtol=1e-2, atol=1e-2), \
        "mismatch vs bf16-matched reference"
    print("KERNEL_OK")
</pallas_src>

<mosaic_0001>
module attributes {stable_mosaic.version = 11 : i64} {
  func.func @_hypergraph_afc_kernel(%arg0: i32, %arg1: memref<1x128x128xf32, #tpu.memory_space<vmem>>, %arg2: memref<128x128xbf16, #tpu.memory_space<vmem>>, %arg3: memref<128x128xbf16, #tpu.memory_space<vmem>>, %arg4: memref<1x128xf32, #tpu.memory_space<vmem>>, %arg5: memref<128x128xbf16, #tpu.memory_space<vmem>>, %arg6: memref<1x128xf32, #tpu.memory_space<vmem>>, %arg7: memref<1xf32, #tpu.memory_space<smem>>, %arg8: memref<1x128x128xf32, #tpu.memory_space<vmem>>) attributes {dimension_semantics = [#tpu.dimension_semantics<parallel>], iteration_bounds = array<i64: 2>, scalar_prefetch = 0 : i64, scratch_operands = 0 : i64, tpu.core_type = #tpu.core_type<tc>, window_params = [{transform_indices = @transform_0, window_bounds = array<i64: 1, 128, 128>}, {pipeline_mode = #tpu.pipeline_mode<synchronous>, transform_indices = @transform_1, window_bounds = array<i64: 128, 128>}, {pipeline_mode = #tpu.pipeline_mode<synchronous>, transform_indices = @transform_2, window_bounds = array<i64: 128, 128>}, {pipeline_mode = #tpu.pipeline_mode<synchronous>, transform_indices = @transform_3, window_bounds = array<i64: 1, 128>}, {pipeline_mode = #tpu.pipeline_mode<synchronous>, transform_indices = @transform_4, window_bounds = array<i64: 128, 128>}, {pipeline_mode = #tpu.pipeline_mode<synchronous>, transform_indices = @transform_5, window_bounds = array<i64: 1, 128>}, {transform_indices = @transform_6, window_bounds = array<i64: 1>}, {transform_indices = @transform_7, window_bounds = array<i64: 1, 128, 128>}]} {
    %c0 = arith.constant 0 : index
    %c0_0 = arith.constant 0 : index
    %c0_1 = arith.constant 0 : index
    %0 = vector.load %arg1[%c0, %c0_0, %c0_1] : memref<1x128x128xf32, #tpu.memory_space<vmem>>, vector<1x128x128xf32>
    %1 = vector.shape_cast %0 : vector<1x128x128xf32> to vector<128x128xf32>
    %c0_2 = arith.constant 0 : index
    %c0_3 = arith.constant 0 : index
    %2 = vector.load %arg2[%c0_2, %c0_3] : memref<128x128xbf16, #tpu.memory_space<vmem>>, vector<128x128xbf16>
    %c0_4 = arith.constant 0 : index
    %3 = memref.load %arg7[%c0_4] : memref<1xf32, #tpu.memory_space<smem>>
    %4 = arith.truncf %1 : vector<128x128xf32> to vector<128x128xbf16>
    %c0_5 = arith.constant 0 : index
    %c0_6 = arith.constant 0 : index
    %5 = vector.load %arg3[%c0_5, %c0_6] : memref<128x128xbf16, #tpu.memory_space<vmem>>, vector<128x128xbf16>
    %cst = arith.constant dense<0.000000e+00> : vector<128x128xf32>
    %6 = tpu.matmul %4, %5, %cst {dimension_numbers = #tpu.dot_dimension_numbers<[1], [0], [0], [1], [0, 0, 1, 1], [], []>} : vector<128x128xbf16>, vector<128x128xbf16>, vector<128x128xf32> -> vector<128x128xf32>
    %7 = arith.truncf %6 : vector<128x128xf32> to vector<128x128xbf16>
    %cst_7 = arith.constant dense<0.000000e+00> : vector<128x128xf32>
    %8 = tpu.matmul %2, %7, %cst_7 {dimension_numbers = #tpu.dot_dimension_numbers<[1], [0], [0], [1], [0, 0, 1, 1], [], []>} : vector<128x128xbf16>, vector<128x128xbf16>, vector<128x128xf32> -> vector<128x128xf32>
    %c0_8 = arith.constant 0 : index
    %c0_9 = arith.constant 0 : index
    %9 = vector.load %arg4[%c0_8, %c0_9] : memref<1x128xf32, #tpu.memory_space<vmem>>, vector<1x128xf32>
    %10 = vector.broadcast %9 : vector<1x128xf32> to vector<128x128xf32>
    %11 = arith.addf %8, %10 : vector<128x128xf32>
    %cst_10 = arith.constant 0.000000e+00 : f32
    %12 = vector.broadcast %cst_10 : f32 to vector<128x128xf32>
    %13 = arith.cmpf oge, %11, %12 : vector<128x128xf32>
    %14 = vector.broadcast %3 : f32 to vector<128x128xf32>
    %15 = arith.mulf %14, %11 : vector<128x128xf32>
    %16 = arith.select %13, %11, %15 : vector<128x128xi1>, vector<128x128xf32>
    %17 = arith.truncf %16 : vector<128x128xf32> to vector<128x128xbf16>
    %c0_11 = arith.constant 0 : index
    %c0_12 = arith.constant 0 : index
    %18 = vector.load %arg5[%c0_11, %c0_12] : memref<128x128xbf16, #tpu.memory_space<vmem>>, vector<128x128xbf16>
    %cst_13 = arith.constant dense<0.000000e+00> : vector<128x128xf32>
    %19 = tpu.matmul %17, %18, %cst_13 {dimension_numbers = #tpu.dot_dimension_numbers<[1], [0], [0], [1], [0, 0, 1, 1], [], []>} : vector<128x128xbf16>, vector<128x128xbf16>, vector<128x128xf32> -> vector<128x128xf32>
    %20 = arith.truncf %19 : vector<128x128xf32> to vector<128x128xbf16>
    %cst_14 = arith.constant dense<0.000000e+00> : vector<128x128xf32>
    %21 = tpu.matmul %2, %20, %cst_14 {dimension_numbers = #tpu.dot_dimension_numbers<[1], [0], [0], [1], [0, 0, 1, 1], [], []>} : vector<128x128xbf16>, vector<128x128xbf16>, vector<128x128xf32> -> vector<128x128xf32>
    %c0_15 = arith.constant 0 : index
    %c0_16 = arith.constant 0 : index
    %22 = vector.load %arg6[%c0_15, %c0_16] : memref<1x128xf32, #tpu.memory_space<vmem>>, vector<1x128xf32>
    %23 = vector.broadcast %22 : vector<1x128xf32> to vector<128x128xf32>
    %24 = arith.addf %21, %23 : vector<128x128xf32>
    %25 = arith.addf %24, %1 : vector<128x128xf32>
    %cst_17 = arith.constant 0.000000e+00 : f32
    %26 = vector.broadcast %cst_17 : f32 to vector<128x128xf32>
    %27 = arith.cmpf oge, %25, %26 : vector<128x128xf32>
    %28 = vector.broadcast %3 : f32 to vector<128x128xf32>
    %29 = arith.mulf %28, %25 : vector<128x128xf32>
    %30 = arith.select %27, %25, %29 : vector<128x128xi1>, vector<128x128xf32>
    %c0_18 = arith.constant 0 : index
    %c0_19 = arith.constant 0 : index
    %c0_20 = arith.constant 0 : index
    %31 = vector.load %arg8[%c0_18, %c0_19, %c0_20] : memref<1x128x128xf32, #tpu.memory_space<vmem>>, vector<1x128x128xf32>
    %32 = vector.shape_cast %31 : vector<1x128x128xf32> to vector<128x128xf32>
    %33 = vector.shape_cast %30 : vector<128x128xf32> to vector<1x128x128xf32>
    tpu.vector_store %arg8[%c0_18, %c0_19, %c0_20], %33 {strides = array<i32>} : memref<1x128x128xf32, #tpu.memory_space<vmem>>, vector<1x128x128xf32>,
    return
  }
  func.func @transform_0(%arg0: i32) -> (i32, i32, i32) {
    %c0_i32 = arith.constant 0 : i32
    %c0_i32_0 = arith.constant 0 : i32
    %c0_i32_1 = arith.constant 0 : i32
    return %arg0, %c0_i32, %c0_i32_0 : i32, i32, i32
  }
  func.func @transform_1(%arg0: i32) -> (i32, i32) {
    %c0_i32 = arith.constant 0 : i32
    %c0_i32_0 = arith.constant 0 : i32
    %c0_i32_1 = arith.constant 0 : i32
    return %c0_i32, %c0_i32_0 : i32, i32
  }
  func.func @transform_2(%arg0: i32) -> (i32, i32) {
    %c0_i32 = arith.constant 0 : i32
    %c0_i32_0 = arith.constant 0 : i32
    %c0_i32_1 = arith.constant 0 : i32
    return %c0_i32, %c0_i32_0 : i32, i32
  }
  func.func @transform_3(%arg0: i32) -> (i32, i32) {
    %c0_i32 = arith.constant 0 : i32
    %c0_i32_0 = arith.constant 0 : i32
    %c0_i32_1 = arith.constant 0 : i32
    return %c0_i32, %c0_i32_0 : i32, i32
  }
  func.func @transform_4(%arg0: i32) -> (i32, i32) {
    %c0_i32 = arith.constant 0 : i32
    %c0_i32_0 = arith.constant 0 : i32
    %c0_i32_1 = arith.constant 0 : i32
    return %c0_i32, %c0_i32_0 : i32, i32
  }
  func.func @transform_5(%arg0: i32) -> (i32, i32) {
    %c0_i32 = arith.constant 0 : i32
    %c0_i32_0 = arith.constant 0 : i32
    %c0_i32_1 = arith.constant 0 : i32
    return %c0_i32, %c0_i32_0 : i32, i32
  }
  func.func @transform_6(%arg0: i32) -> i32 {
    %c0_i32 = arith.constant 0 : i32
    %c0_i32_0 = arith.constant 0 : i32
    return %c0_i32 : i32
  }
  func.func @transform_7(%arg0: i32) -> (i32, i32, i32) {
    %c0_i32 = arith.constant 0 : i32
    %c0_i32_0 = arith.constant 0 : i32
    %c0_i32_1 = arith.constant 0 : i32
    return %arg0, %c0_i32, %c0_i32_0 : i32, i32, i32
  }
}

</mosaic_0001>

<bundles_post_ra>
// kernel: tpu_custom_call.1
= control target key start
LH: loop header
LB: loop body
LE: loop exit
PB: predicated region body
PF: predicated region fallthrough
CT: control target
= control target key end

     0   :  { %s2303_s0 = inlined_call_operand.hbm [shape: f32[2,128,128], index: 0, kind: input, shape index: {}]   ;;  %s2304_s1 = inlined_call_operand.hbm [shape: bf16[128,128], index: 1, kind: input, shape index: {}]   ;;  %s2305_s2 = inlined_call_operand.hbm [shape: bf16[128,128], index: 2, kind: input, shape index: {}]   ;;  %s2306_s3 = inlined_call_operand.vmem [shape: f32[1,128], index: 3, kind: input, shape index: {}]   ;;  %s2307_s4 = inlined_call_operand.hbm [shape: bf16[128,128], index: 4, kind: input, shape index: {}]   ;;  %s2308_s5 = inlined_call_operand.vmem [shape: f32[1,128], index: 5, kind: input, shape index: {}]   ;;  %s2309_s6 = inlined_call_operand.<no memory space> [shape: f32[1], index: 6, kind: input, shape index: {}]   ;;  %s2310_s7 = inlined_call_operand.hbm [shape: f32[2,128,128], index: 7, kind: output, shape index: {}]  }
   0x1   :  { %12 = sst [smem:[#allocation2]] %s2309_s6 }
   0x2   :  { %13 = vsyncpa [#allocation4], 0 }
   0x3   :  { %15 = vsyncpa [#allocation4 + $0x1], 0 }
   0x4   :  { %16 = vsyncpa [#allocation7], 0 }
   0x5   :  { %17 = vsyncpa [#allocation10], 0 }
   0x6   :  { %18 = vsyncpa [#allocation5], 0 }
   0x7   :  { %20 = vsyncpa [#allocation5 + $0x1], 0  ;;  %s1822_s26 = smov 0   ;;  %s1824_s27 = smov 0  }
   0x8   :  { %s1826_s28 = smov 0   ;;  %s1828_s29 = smov 0  }
   0x9 LB: > { %s1843_s6 = sadd.s32 4294967295, %s1766_s29   ;;  %s1231_s30 = sadd.s32 4294967294, %s1766_s29   ;;  %s1766_s29 = sphi %s1828_s29, %s2333_s29   ;;  %s1762_s28 = sphi %s1826_s28, %s2332_s28   ;;  %s1758_s27 = sphi %s1824_s27, %s2331_s27   ;;  %s1754_s26 = sphi %s1822_s26, %s2330_s26  }
   0xa   : > { %p46_p0 = scmp.ne.s32.totalorder %s1758_s27, %s1754_s26  ;;  %p2311_p1 = scmp.eq.s32.totalorder %s1843_s6, 0 }
   0xb   : > { %p202_p3 = scmp.eq.s32.totalorder %s1231_s30, 1  ;;  %p1232_p5 = scmp.ge.s32.totalorder %s1766_s29, 1 }
   0xc   : > { %p1852_p4 = por %p2311_p1, %p46_p0  ;;  %p209_p7 = scmp.lt.s32.totalorder %s1766_s29, 3 }
   0xd   : > { %p1857_p6 = por %p202_p3, %p46_p0  ;;  %s1768_s11 = smov [#allocation6]  }
   0xe   : > { %s2314_s8 = scalar_select %p1852_p4, 1, 0 }
   0xf   : > { %s2315_s9 = scalar_select %p1857_p6, 1, 0 }
  0x10   : > { %p1862_p8 = pnand %p1232_p5, %p209_p7  ;;  %s221_s12 = sshll.u32 %s1768_s11, 4  ;;  %s1866_s12 = int_to_ptr.vmem [resolvable:$true] %s221_s12 }
  0x11   : > { %s1769_s14 = smov [#allocation8]   ;;  %s1770_s16 = smov [#allocation9]  }
  0x12   : > { %s2316_s10 = scalar_select %p1862_p8, 1, 0 }
  0x13   : > { %p1487_p9 = pneg %p1862_p8  ;;  %s234_s15 = sshll.u32 %s1769_s14, 4  ;;  %s1877_s15 = int_to_ptr.vmem [resolvable:$true] %s234_s15 }
  0x14   : > { %s1879_s17 = sshll.u32 %s1770_s16, 4  ;;  %s1578_s20 = scalar_lea.hbm %s2304_s1, 1024  ;;  %s251_s17 = int_to_ptr.vmem [resolvable:$true] %s1879_s17 }
  0x15   : > { %p1873_p11 = pnand %p1487_p9, %p2311_p1  ;;  %p1579_p12 = scmp.ne.s32.totalorder %s2304_s1, %s1578_s20 }
  0x16   : > { %p1585_p5 = scmp.lt.u32.totalorder %s1578_s20, %s2304_s1 }
  0x17   : > { %p1889_p13 = pneg %p1873_p11 }
  0x19   : > { %p1581_p0 = pnand %p1889_p13, %p1579_p12 }
  0x1b   : > { %p1582_p3 = pneg %p1581_p0 }
  0x1d   : > { %p1587_p7 = pnand %p1585_p5, %p1582_p3 }
  0x1f   : > { %1590 = shalt.err (!%p1587_p7)
}
  0x20   : > { %s1591_s30 = scalar_lea.vmem %s1866_s12, 1024  ;;  %p1599_p2 = scmp.lt.s32.totalorder %s1866_s12, %s1866_s12 }
  0x21   : > { %p1592_p9 = scmp.ne.s32.totalorder %s1866_s12, %s1591_s30  ;;  %p1600_p6 = scmp.lt.s32.totalorder %s1591_s30, %s1591_s30 }
  0x23   : > { %p1594_p10 = pnand %p1592_p9, %p1889_p13  ;;  %p1601_p12 = por %p1600_p6, %p1599_p2 }
  0x25   : > { %p1595_p1 = pneg %p1594_p10 }
  0x27   : > { %p1602_p0 = pnand %p1601_p12, %p1595_p1 }
  0x29   : > { %1605 = shalt.err (!%p1602_p0)
}
  0x2a   : > { %s1771_s11 = smov 64   ;;  %s1772_s14 = smov 4  }
  0x2b   : > { %1490 = dma.hbm_to_vmem [thread:$0]  (!%p1873_p11), %s2304_s1, 1024, %s1866_s12, [#allocation7], %s1771_s11, %s1771_s11, %s1772_s14  }
  0x2c   : > { %s1606_s21 = scalar_lea.hbm %s2305_s2, 1024 }
  0x2d   : > { %p1607_p1 = scmp.ne.s32.totalorder %s2305_s2, %s1606_s21  ;;  %p1613_p10 = scmp.lt.u32.totalorder %s1606_s21, %s2305_s2 }
  0x2f   : > { %p1609_p2 = pnand %p1607_p1, %p1889_p13 }
  0x31   : > { %p1610_p6 = pneg %p1609_p2 }
  0x33   : > { %p1615_p3 = pnand %p1613_p10, %p1610_p6 }
  0x35   : > { %1618 = shalt.err (!%p1615_p3)
}
  0x36   : > { %s1619_s12 = scalar_lea.vmem %s1877_s15, 1024  ;;  %p1627_p12 = scmp.lt.s32.totalorder %s1877_s15, %s1877_s15 }
  0x37   : > { %p1620_p5 = scmp.ne.s32.totalorder %s1877_s15, %s1619_s12  ;;  %p1628_p0 = scmp.lt.s32.totalorder %s1619_s12, %s1619_s12 }
  0x39   : > { %p1622_p7 = pnand %p1620_p5, %p1889_p13  ;;  %p1629_p1 = por %p1628_p0, %p1627_p12 }
  0x3b   : > { %p1623_p9 = pneg %p1622_p7 }
  0x3d   : > { %p1630_p2 = pnand %p1629_p1, %p1623_p9 }
  0x3f   : > { %1633 = shalt.err (!%p1630_p2)
}
  0x40   : > { %1493 = dma.hbm_to_vmem [thread:$0]  (!%p1873_p11), %s2305_s2, 1024, %s1877_s15, [#allocation7], %s1771_s11, %s1771_s11, %s1772_s14  }
  0x41   : > { %s1634_s21 = scalar_lea.hbm %s2307_s4, 1024 }
  0x42   : > { %p1635_p6 = scmp.ne.s32.totalorder %s2307_s4, %s1634_s21  ;;  %p1641_p5 = scmp.lt.u32.totalorder %s1634_s21, %s2307_s4 }
  0x44   : > { %p1637_p10 = pnand %p1635_p6, %p1889_p13 }
  0x46   : > { %p1638_p3 = pneg %p1637_p10 }
  0x48   : > { %p1643_p7 = pnand %p1641_p5, %p1638_p3 }
  0x4a   : > { %1646 = shalt.err (!%p1643_p7)
}
  0x4b   : > { %s1647_s12 = scalar_lea.vmem %s251_s17, 1024  ;;  %p1655_p1 = scmp.lt.s32.totalorder %s251_s17, %s251_s17 }
  0x4c   : > { %p1648_p9 = scmp.ne.s32.totalorder %s251_s17, %s1647_s12  ;;  %p1656_p2 = scmp.lt.s32.totalorder %s1647_s12, %s1647_s12 }
  0x4e   : > { %p1650_p12 = pnand %p1648_p9, %p1889_p13  ;;  %p1657_p4 = por %p1656_p2, %p1655_p1 }
  0x50   : > { %p1651_p0 = pneg %p1650_p12 }
  0x52   : > { %p1658_p8 = pnand %p1657_p4, %p1651_p0 }
  0x54   : > { %1661 = shalt.err (!%p1658_p8)
}
  0x55   : > { %1496 = dma.hbm_to_vmem [thread:$0]  (!%p1873_p11), %s2307_s4, 1024, %s251_s17, [#allocation10], %s1771_s11, %s1771_s11, %s1772_s14  }
  0x56   : > { %s1962_s23 = sadd.s32 1, %s1766_s29   ;;  %s33_s18 = sadd.s32 1, %s1762_s28 }
  0x57   : > { %s30_s13 = ssub.s32 %s1766_s29, %s1962_s23  ;;  %p40_p8 = scmp.ne.s32.totalorder %s1762_s28, %s1758_s27 }
  0x58   : > { %p31_p4 = scmp.eq.s32.totalorder %s30_s13, 0  ;;  %p41_p13 = scmp.eq.s32.totalorder %s1766_s29, 0 }
  0x59   : > { %p1508_p6 = scmp.lt.s32.totalorder %s1766_s29, 2  ;;  %p2319_p3 = scmp.eq.s32.totalorder %s1843_s6, 1 }
  0x5a   : > { %s1972_s19 = scalar_select %p31_p4, %s1762_s28, %s33_s18  }
  0x5b   : > { %p42_p10 = por %p41_p13, %p40_p8  ;;  %p1976_p5 = por %p2319_p3, %p40_p8 }
  0x5c   : > { %s270_s21 = sand.u32 1, %s1762_s28   ;;  %s1277_s22 = sshll.u32 %s1766_s29, 11 }
  0x5d   : > { %s1237_s17 = sshll.u32 %s270_s21, 7  ;;  %s1985_s24 = scalar_lea.hbm %s2303_s0, %s1277_s22 }
  0x5e   : > { %s274_s25 = scalar_lea.vmem [#allocation3], %s1237_s17  ;;  %p1987_p11 = pnand %p1508_p6, %p42_p10 }
  0x5f   : > { %s281_s30 = sshll.u32 %s274_s25, 4  ;;  %s1993_s15 = scalar_lea.sflag [#allocation4], %s270_s21  ;;  %s1991_s30 = int_to_ptr.vmem [resolvable:$true] %s281_s30 }
  0x60   : > { %s1662_s16 = scalar_lea.hbm %s1985_s24, 2048  ;;  %p1664_p9 = pneg %p1987_p11 }
  0x61   : > { %p1663_p7 = scmp.ne.s32.totalorder %s1985_s24, %s1662_s16  ;;  %s1667_s22 = scalar_lea.hbm %s2303_s0, 4096 }
  0x62   : > { %p1668_p1 = scmp.lt.u32.totalorder %s1985_s24, %s2303_s0  ;;  %p1669_p2 = scmp.lt.u32.totalorder %s1667_s22, %s1662_s16 }
  0x63   : > { %p1665_p12 = pnand %p1664_p9, %p1663_p7  ;;  %p1671_p8 = scmp.lt.u32.totalorder %s1662_s16, %s1985_s24 }
  0x64   : > { %p1670_p4 = por %p1669_p2, %p1668_p1 }
  0x65   : > { %p1666_p0 = pneg %p1665_p12 }
  0x66   : > { %p1672_p13 = por %p1671_p8, %p1670_p4 }
  0x68   : > { %p1673_p6 = pnand %p1672_p13, %p1666_p0 }
  0x6a   : > { %1676 = shalt.err (!%p1673_p6)
}
  0x6b   : > { %s1677_s21 = scalar_lea.vmem %s1991_s30, 2048  ;;  %s1773_s14 = smov [#allocation3]  }
  0x6c   : > { %p1678_p10 = scmp.ne.s32.totalorder %s1991_s30, %s1677_s21  ;;  %s1682_s25 = sshll.u32 %s1773_s14, 4  ;;  %s1683_s25 = int_to_ptr.vmem [resolvable:$false] %s1682_s25 }
  0x6d   : > { %s1684_s13 = scalar_lea.vmem %s1683_s25, 4096  ;;  %p1685_p12 = scmp.lt.s32.totalorder %s1991_s30, %s1683_s25 }
  0x6e   : > { %p1680_p3 = pnand %p1678_p10, %p1664_p9  ;;  %p1686_p1 = scmp.lt.s32.totalorder %s1684_s13, %s1677_s21 }
  0x70   : > { %p1681_p7 = pneg %p1680_p3  ;;  %p1687_p2 = por %p1686_p1, %p1685_p12 }
  0x72   : > { %p1688_p4 = pnand %p1687_p2, %p1681_p7 }
  0x74   : > { %1691 = shalt.err (!%p1688_p4)
}
  0x75   : > { %s1774_s16 = smov 128   ;;  %s1775_s18 = smov 8  }
  0x76   : > { %1500 = dma.hbm_to_vmem [thread:$0]  (!%p1987_p11), %s1985_s24, 2048, %s1991_s30, %s1993_s15, %s1774_s16, %s1774_s16, %s1775_s18  }
  0x77   : > { %p2322_p9 = scmp.ne.s32.totalorder %s2316_s10, 0 }
  0x78   : > { %s2024_s22 = sand.u32 (!%p2322_p9), 1, %s1758_s27   ;;  %p2323_p0 = scmp.ne.s32.totalorder (!%p2322_p9), %s2314_s8, 0 }
  0x79   : > { %293 = sbr.rel (%p2322_p9) target bundleno = 1151 (0x47f), region = 48  ;;  %s1241_s17 = sshll.u32 (!%p2322_p9), %s2024_s22, 7 }
  0x7a   : > { %s296_s11 = scalar_lea.sflag (!%p2322_p9), [#allocation4], %s2024_s22  ;;  %s2030_s21 = scalar_lea.vmem (!%p2322_p9), [#allocation3], %s1241_s17 }
  0x80   : > { %1737 = dma.done.wait (%p2323_p0), %s296_s11, 2048  }
  0x81   : > { %1739 = vsyncadd (%p2323_p0), %s296_s11, 4294965248  ;;  %p2324_p11 = scmp.eq.s32.totalorder %s1843_s6, 0 }
  0x83   : > { %1741 = dma.done.wait (%p2324_p11), [#allocation7], 2048   ;;  %p2325_p8 = pmov %p2324_p11 }
  0x85   : > { %1743 = vsyncadd (%p2325_p8), [#allocation7], 4294965248  ;;  %p2326_p13 = pmov %p2325_p8 }
  0x86   : > { %p2327_p6 = pmov %p2325_p8 }
  0x87   : > { %1745 = dma.done.wait (%p2326_p13), [#allocation10], 1024  }
  0x88   : > { %1747 = vsyncadd (%p2327_p6), [#allocation10], 4294966272  ;;  %v1554_v0 = vld [vmem:[#allocation8] sm:$0xff]   ;;  %v1555_v1 = vld [vmem:[#allocation8 + $0x8] sm:$0xff]   ;;  %s375_s8 = sld [smem:[#allocation2]]  ;;  %s2197_s15 = scalar_lea.vmem [#allocation11], %s1241_s17 }
  0x89   : > { %1343 = vmatprep.subr.bf16.mxu0 %v1554_v0  ;;  %v1556_v2 = vld [vmem:[#allocation8 + $0x10] sm:$0xff]   ;;  %v1557_v3 = vld [vmem:[#allocation8 + $0x18] sm:$0xff]   ;;  %v2045_v4 = vld [vmem:[%s2030_s21] sm:$0xff]  ;;  %s1278_s14 = sshll.u32 %s1843_s6, 11  ;;  %s1129_s25 = sshll.u32 %s2197_s15, 4  ;;  %s2256_s25 = int_to_ptr.vmem [resolvable:$true] %s1129_s25 }
  0x8a   : > { %1344 = vmatpush3.bf16.msra.mxu0 %v1554_v0  ;;  %v2048_v5 = vld [vmem:[%s2030_s21 + $0x8] sm:$0xff]  ;;  %v1558_v7 = vld [vmem:[#allocation8 + $0x20] sm:$0xff]   ;;  %v1560_v9 = vld [vmem:[#allocation8 + $0x30] sm:$0xff]   ;;  %s2254_s16 = scalar_lea.hbm %s2310_s7, %s1278_s14  ;;  %s1116_s18 = scalar_lea.sflag [#allocation5], %s2024_s22 }
  0x8b   : > { %1345 = vmatprep.subr.bf16.mxu0 %v1555_v1  ;;  %v376_v6 = vpack.c.bf16 %v2048_v5, %v2045_v4  ;;  %v1559_v8 = vld [vmem:[#allocation8 + $0x28] sm:$0xff]   ;;  %v1561_v10 = vld [vmem:[#allocation8 + $0x38] sm:$0xff]   ;;  %v2053_v11 = vld [vmem:[%s2030_s21 + $0x10] sm:$0xff]  ;;  %s1692_s17 = scalar_lea.vmem %s2256_s25, 2048  ;;  %s1776_s11 = smov [#allocation11]  }
  0x8c   : > { %v2056_v12 = vld [vmem:[%s2030_s21 + $0x18] sm:$0xff]  ;;  %v2059_v13 = vld [vmem:[%s2030_s21 + $0x20] sm:$0xff]  ;;  %v2062_v14 = vld [vmem:[%s2030_s21 + $0x28] sm:$0xff]  ;;  %p1693_p10 = scmp.ne.s32.totalorder %s2256_s25, %s1692_s17 }
  0x8d   : > { %1359 = vmatprep.mubr.bf16.mxu0 %v376_v6  ;;  %v377_v15 = vpack.c.bf16 %v2056_v12, %v2053_v11  ;;  %v378_v16 = vpack.c.bf16 %v2062_v14, %v2059_v13  ;;  %v2069_v17 = vld [vmem:[%s2030_s21 + $0x30] sm:$0xff]  ;;  %v2072_v18 = vld [vmem:[%s2030_s21 + $0x38] sm:$0xff]  ;;  %v2075_v19 = vld [vmem:[%s2030_s21 + $0x40] sm:$0xff] }
  0x8e   : > { %1346 = vmatpush3.bf16.msra.mxu0 %v1555_v1  ;;  %v2078_v20 = vld [vmem:[%s2030_s21 + $0x48] sm:$0xff]  ;;  %v379_v21 = vpack.c.bf16 %v2072_v18, %v2069_v17  ;;  %v2085_v23 = vld [vmem:[%s2030_s21 + $0x50] sm:$0xff]  ;;  %v2088_v24 = vld [vmem:[%s2030_s21 + $0x58] sm:$0xff]  ;;  %p1694_p3 = pnand %p1693_p10, %p1976_p5 }
  0x8f   : > { %1347 = vmatprep.subr.bf16.mxu0 %v1556_v2  ;;  %v380_v22 = vpack.c.bf16 %v2078_v20, %v2075_v19  ;;  %v2091_v25 = vld [vmem:[%s2030_s21 + $0x60] sm:$0xff]  ;;  %v2094_v26 = vld [vmem:[%s2030_s21 + $0x68] sm:$0xff]  ;;  %v381_v27 = vpack.c.bf16 %v2088_v24, %v2085_v23  ;;  %v2101_v29 = vld [vmem:[%s2030_s21 + $0x70] sm:$0xff] }
  0x90   : > { %v382_v28 = vpack.c.bf16 %v2094_v26, %v2091_v25  ;;  %v2104_v30 = vld [vmem:[%s2030_s21 + $0x78] sm:$0xff]  ;;  %v2108_v32 = vld [vmem:[#allocation6] sm:$0xff]   ;;  %v1571_v34 = vld [vmem:[#allocation9 + $0x8] sm:$0xff]   ;;  %p1695_p7 = pneg %p1694_p3  ;;  %s1696_s21 = sshll.u32 %s1776_s11, 4  ;;  %s1697_s21 = int_to_ptr.vmem [resolvable:$false] %s1696_s21 }
  0x91   : > { %v383_v31 = vpack.c.bf16 %v2104_v30, %v2101_v29  ;;  %1391 = vmatprep.mubr.bf16.mxu1 %v2108_v32  ;;  %v1570_v33 = vld [vmem:[#allocation9] sm:$0xff]   ;;  %v1572_v35 = vld [vmem:[#allocation9 + $0x10] sm:$0xff]   ;;  %v1573_v36 = vld [vmem:[#allocation9 + $0x18] sm:$0xff]   ;;  %p1699_p12 = scmp.lt.s32.totalorder %s2256_s25, %s1697_s21 }
  0x92   : > { %1348 = vmatpush3.bf16.msra.mxu0 %v1556_v2  ;;  %v1574_v37 = vld [vmem:[#allocation9 + $0x20] sm:$0xff]   ;;  %v2111_v62 = vld [vmem:[#allocation6 + $0x8] sm:$0xff]   ;;  %v2113_v63 = vld [vmem:[#allocation6 + $0x10] sm:$0xff]  }
  0x93   : > { %1349 = vmatprep.subr.bf16.mxu0 %v1557_v3  ;;  %v2117_v0 = vld [vmem:[#allocation6 + $0x18] sm:$0xff]   ;;  %v2119_v1 = vld [vmem:[#allocation6 + $0x20] sm:$0xff]   ;;  %v2123_v2 = vld [vmem:[#allocation6 + $0x28] sm:$0xff]  }
  0x94   : > { %v2129_v6 = vld [vmem:[#allocation6 + $0x38] sm:$0xff]  }
  0x96   : > { %1350 = vmatpush3.bf16.msra.mxu0 %v1557_v3  ;;  %v2125_v3 = vld [vmem:[#allocation6 + $0x30] sm:$0xff]  }
  0x97   : > { %1351 = vmatprep.subr.bf16.mxu0 %v1558_v7 }
  0x9a   : > { %1352 = vmatpush3.bf16.msra.mxu0 %v1558_v7  ;;  %v1575_v7 = vld [vmem:[#allocation9 + $0x28] sm:$0xff]  }
  0x9b   : > { %1353 = vmatprep.subr.bf16.mxu0 %v1559_v8 }
  0x9e   : > { %1354 = vmatpush3.bf16.msra.mxu0 %v1559_v8  ;;  %v1576_v8 = vld [vmem:[#allocation9 + $0x30] sm:$0xff]  }
  0x9f   : > { %1355 = vmatprep.subr.bf16.mxu0 %v1560_v9 }
  0xa2   : > { %1356 = vmatpush3.bf16.msra.mxu0 %v1560_v9  ;;  %v1577_v9 = vld [vmem:[#allocation9 + $0x38] sm:$0xff]  }
  0xa3   : > { %1357 = vmatprep.subr.bf16.mxu0 %v1561_v10 }
  0xa6   : > { %1358 = vmatpush3.bf16.msra.mxu0 %v1561_v10  ;;  %v2136_v10 = vld [vmem:[%s2306_s3] ss:$0 sm:$0xff] }
  0xa7   : > { %1407 = vmatprep.subr.bf16.mxu0 %v1570_v33 }
  0xa9   : > { %1360 = vmatmul.mubr.bf16.vlgmr.msra.gmra.mrb[0].mxu0 %v377_v15 }
  0xaa   : > { %1363 = vmatprep.mubr.bf16.mxu0 %v378_v16  ;;  %1408 = vmatpush3.bf16.msra.mxu0 %v1570_v33  ;;  %v2138_v16 = vstv %s375_s8  ;;  %s1698_s8 = scalar_lea.vmem %s1697_s21, 4096 }
  0xab   : > { %1409 = vmatprep.subr.bf16.mxu0 %v1571_v34  ;;  %p1700_p1 = scmp.lt.s32.totalorder %s1698_s8, %s1692_s17 }
  0xad   : > { %p1701_p2 = por %p1700_p1, %p1699_p12 }
  0xae   : > { %1410 = vmatpush3.bf16.msra.mxu0 %v1571_v34 }
  0xaf   : > { %1411 = vmatprep.subr.bf16.mxu0 %v1572_v35  ;;  %p1702_p4 = pnand %p1701_p2, %p1695_p7 }
  0xb1   : > { %1364 = vmatmul.mubr.bf16.gmra.mrb[4].mxu0 %v379_v21 }
  0xb2   : > { %1367 = vmatprep.mubr.bf16.mxu0 %v380_v22  ;;  %1412 = vmatpush3.bf16.msra.mxu0 %v1572_v35 }
  0xb3   : > { %1413 = vmatprep.subr.bf16.mxu0 %v1573_v36 }
  0xb6   : > { %1414 = vmatpush3.bf16.msra.mxu0 %v1573_v36 }
  0xb7   : > { %1415 = vmatprep.subr.bf16.mxu0 %v1574_v37 }
  0xb9   : > { %1368 = vmatmul.mubr.bf16.gmra.mrb[8].mxu0 %v381_v27 }
  0xba   : > { %1371 = vmatprep.mubr.bf16.mxu0 %v382_v28  ;;  %1416 = vmatpush3.bf16.msra.mxu0 %v1574_v37 }
  0xbb   : > { %1417 = vmatprep.subr.bf16.mxu0 %v1575_v7 }
  0xbe   : > { %1418 = vmatpush3.bf16.msra.mxu0 %v1575_v7 }
  0xbf   : > { %1419 = vmatprep.subr.bf16.mxu0 %v1576_v8 }
  0xc1   : > { %1372 = vmatmul.mubr.bf16.gmra.mrb[12].mxu0 %v383_v31 }
  0xc2   : > { %1420 = vmatpush3.bf16.msra.mxu0 %v1576_v8 }
  0xc3   : > { %1421 = vmatprep.subr.bf16.mxu0 %v1577_v9 }
  0xc6   : > { %1422 = vmatpush3.bf16.msra.mxu0 %v1577_v9 }
 0x17c   : > { %v1361_v38 = vpop.f32.mrb[0].mxu0 }
 0x17d   : > { %v482_v39 = vpop.f32.mrb[1].mxu0 }
 0x17e   : > { %v1362_v40 = vpop.f32.mrb[2].mxu0 }
 0x17f   : > { %v546_v41 = vpack.c.bf16 %v1362_v40, %v1361_v38  ;;  %v485_v42 = vpop.f32.mrb[3].mxu0 }
 0x180   : > { %v545_v43 = vpack.c.bf16 %v485_v42, %v482_v39 }
 0x182   : > { %1375 = vmatprep.subr.bf16.mxu1 %v545_v43 }
 0x183   : > { %1376 = vmatpush3.bf16.msra.mxu1 %v545_v43 }
 0x184   : > { %v1365_v44 = vpop.f32.mrb[4].mxu0  ;;  %1377 = vmatprep.subr.bf16.mxu1 %v546_v41 }
 0x185   : > { %v498_v45 = vpop.f32.mrb[5].mxu0 }
 0x186   : > { %v1366_v46 = vpop.f32.mrb[6].mxu0 }
 0x187   : > { %v548_v47 = vpack.c.bf16 %v1366_v46, %v1365_v44  ;;  %v501_v48 = vpop.f32.mrb[7].mxu0  ;;  %1378 = vmatpush3.bf16.msra.mxu1 %v546_v41 }
 0x188   : > { %v547_v49 = vpack.c.bf16 %v501_v48, %v498_v45 }
 0x18a   : > { %1379 = vmatprep.subr.bf16.mxu1 %v547_v49 }
 0x18b   : > { %1380 = vmatpush3.bf16.msra.mxu1 %v547_v49 }
 0x18c   : > { %v1369_v50 = vpop.f32.mrb[8].mxu0  ;;  %1381 = vmatprep.subr.bf16.mxu1 %v548_v47 }
 0x18d   : > { %v514_v51 = vpop.f32.mrb[9].mxu0 }
 0x18e   : > { %v1370_v52 = vpop.f32.mrb[10].mxu0 }
 0x18f   : > { %v550_v53 = vpack.c.bf16 %v1370_v52, %v1369_v50  ;;  %v517_v54 = vpop.f32.mrb[11].mxu0  ;;  %1382 = vmatpush3.bf16.msra.mxu1 %v548_v47 }
 0x190   : > { %v549_v55 = vpack.c.bf16 %v517_v54, %v514_v51 }
 0x192   : > { %1383 = vmatprep.subr.bf16.mxu1 %v549_v55 }
 0x193   : > { %1384 = vmatpush3.bf16.msra.mxu1 %v549_v55 }
 0x194   : > { %v1373_v56 = vpop.f32.mrb[12].mxu0  ;;  %1385 = vmatprep.subr.bf16.mxu1 %v550_v53 }
 0x195   : > { %v530_v57 = vpop.f32.mrb[13].mxu0 }
 0x196   : > { %v1374_v58 = vpop.f32.mrb[14].mxu0 }
 0x197   : > { %v552_v59 = vpack.c.bf16 %v1374_v58, %v1373_v56  ;;  %v533_v60 = vpop.f32.mrb[15].mxu0  ;;  %1386 = vmatpush3.bf16.msra.mxu1 %v550_v53 }
 0x198   : > { %v551_v61 = vpack.c.bf16 %v533_v60, %v530_v57 }
 0x19a   : > { %1387 = vmatprep.subr.bf16.mxu1 %v551_v61 }
 0x19b   : > { %1388 = vmatpush3.bf16.msra.mxu1 %v551_v61 }
 0x19c   : > { %1389 = vmatprep.subr.bf16.mxu1 %v552_v59 }
 0x19f   : > { %1390 = vmatpush3.bf16.msra.mxu1 %v552_v59 }
 0x1a2   : > { %1392 = vmatmul.mubr.bf16.vlgmr.msra.gmra.mrb[0].mxu1 %v2111_v62 }
 0x1a3   : > { %1395 = vmatprep.mubr.bf16.mxu1 %v2113_v63 }
 0x1aa   : > { %1396 = vmatmul.mubr.bf16.gmra.mrb[4].mxu1 %v2117_v0 }
 0x1ab   : > { %1399 = vmatprep.mubr.bf16.mxu1 %v2119_v1 }
 0x1b2   : > { %1400 = vmatmul.mubr.bf16.gmra.mrb[8].mxu1 %v2123_v2 }
 0x1b3   : > { %1403 = vmatprep.mubr.bf16.mxu1 %v2125_v3 }
 0x1ba   : > { %1404 = vmatmul.mubr.bf16.gmra.mrb[12].mxu1 %v2129_v6 }
 0x1bb   : > { %1455 = vmatprep.mubr.bf16.mxu1 %v2108_v32 }
 0x275   : > { %v1393_v15 = vpop.f32.mrb[0].mxu1 }
 0x276   : > { %v651_v21 = vadd.f32 %v1393_v15, %v2136_v10  ;;  %v642_v22 = vpop.f32.mrb[1].mxu1 }
 0x277   : > { %v643_v27 = vadd.f32 %v2136_v10, %v642_v22  ;;  %v1394_v28 = vpop.f32.mrb[2].mxu1 }
 0x278   : > { %v724_v31 = vmul.f32 %v2138_v16, %v651_v21  ;;  %v654_v32 = vadd.f32 %v1394_v28, %v2136_v10  ;;  %v645_v33 = vpop.f32.mrb[3].mxu1  ;;  %vm707_vm0 = vcmp.ge.f32.partialorder %v651_v21, 0.0 }
 0x279   : > { %v722_v34 = vmul.f32 %v2138_v16, %v643_v27  ;;  %v646_v35 = vadd.f32 %v2136_v10, %v645_v33  ;;  %vm705_vm1 = vcmp.ge.f32.partialorder %v643_v27, 0.0 }
 0x27a   : > { %vm708_vm2 = vcmp.ge.f32.partialorder %v654_v32, 0.0  ;;  %v725_v36 = vmul.f32 %v2138_v16, %v654_v32  ;;  %v740_v38 = vsel %vm707_vm0, %v651_v21, %v724_v31 }
 0x27b   : > { %vm706_vm3 = vcmp.ge.f32.partialorder %v646_v35, 0.0  ;;  %v723_v37 = vmul.f32 %v2138_v16, %v646_v35  ;;  %v738_v42 = vsel %vm705_vm1, %v643_v27, %v722_v34 }
 0x27c   : > { %v741_v39 = vsel %vm708_vm2, %v654_v32, %v725_v36 }
 0x27d   : > { %v755_v40 = vpack.c.bf16 %v741_v39, %v740_v38  ;;  %v1397_v41 = vpop.f32.mrb[4].mxu1  ;;  %v739_v43 = vsel %vm706_vm3, %v646_v35, %v723_v37 }
 0x27e   : > { %v667_v44 = vadd.f32 %v1397_v41, %v2136_v10  ;;  %v658_v45 = vpop.f32.mrb[5].mxu1  ;;  %v754_v46 = vpack.c.bf16 %v739_v43, %v738_v42 }
 0x27f   : > { %v659_v47 = vadd.f32 %v2136_v10, %v658_v45  ;;  %v1398_v48 = vpop.f32.mrb[6].mxu1 }
 0x280   : > { %v728_v49 = vmul.f32 %v2138_v16, %v667_v44  ;;  %v670_v50 = vadd.f32 %v1398_v48, %v2136_v10  ;;  %v661_v51 = vpop.f32.mrb[7].mxu1  ;;  %1423 = vmatprep.mubr.bf16.mxu0 %v754_v46  ;;  %vm711_vm4 = vcmp.ge.f32.partialorder %v667_v44, 0.0 }
 0x281   : > { %v726_v52 = vmul.f32 %v2138_v16, %v659_v47  ;;  %v662_v53 = vadd.f32 %v2136_v10, %v661_v51  ;;  %1424 = vmatmul.mubr.bf16.vlgmr.msra.gmra.mrb[16].mxu0 %v755_v40  ;;  %vm709_vm5 = vcmp.ge.f32.partialorder %v659_v47, 0.0 }
 0x282   : > { %vm712_vm6 = vcmp.ge.f32.partialorder %v670_v50, 0.0  ;;  %v729_v54 = vmul.f32 %v2138_v16, %v670_v50  ;;  %v744_v56 = vsel %vm711_vm4, %v667_v44, %v728_v49 }
 0x283   : > { %vm710_vm7 = vcmp.ge.f32.partialorder %v662_v53, 0.0  ;;  %v727_v55 = vmul.f32 %v2138_v16, %v662_v53  ;;  %v742_v59 = vsel %vm709_vm5, %v659_v47, %v726_v52 }
 0x284   : > { %v745_v57 = vsel %vm712_vm6, %v670_v50, %v729_v54 }
 0x285   : > { %v1401_v58 = vpop.f32.mrb[8].mxu1  ;;  %v743_v60 = vsel %vm710_vm7, %v662_v53, %v727_v55  ;;  %v757_v61 = vpack.c.bf16 %v745_v57, %v744_v56 }
 0x286   : > { %v683_v7 = vadd.f32 %v1401_v58, %v2136_v10  ;;  %v674_v8 = vpop.f32.mrb[9].mxu1  ;;  %v756_v9 = vpack.c.bf16 %v743_v60, %v742_v59 }
 0x287   : > { %v675_v15 = vadd.f32 %v2136_v10, %v674_v8  ;;  %v1402_v21 = vpop.f32.mrb[10].mxu1 }
 0x288   : > { %v732_v22 = vmul.f32 %v2138_v16, %v683_v7  ;;  %v686_v27 = vadd.f32 %v1402_v21, %v2136_v10  ;;  %v677_v28 = vpop.f32.mrb[11].mxu1  ;;  %1427 = vmatprep.mubr.bf16.mxu0 %v756_v9  ;;  %vm715_vm8 = vcmp.ge.f32.partialorder %v683_v7, 0.0 }
 0x289   : > { %v730_v31 = vmul.f32 %v2138_v16, %v675_v15  ;;  %v678_v32 = vadd.f32 %v2136_v10, %v677_v28  ;;  %1428 = vmatmul.mubr.bf16.gmra.mrb[20].mxu0 %v757_v61  ;;  %vm713_vm9 = vcmp.ge.f32.partialorder %v675_v15, 0.0 }
 0x28a   : > { %vm716_vm10 = vcmp.ge.f32.partialorder %v686_v27, 0.0  ;;  %v733_v33 = vmul.f32 %v2138_v16, %v686_v27  ;;  %v748_v35 = vsel %vm715_vm8, %v683_v7, %v732_v22 }
 0x28b   : > { %vm714_vm11 = vcmp.ge.f32.partialorder %v678_v32, 0.0  ;;  %v731_v34 = vmul.f32 %v2138_v16, %v678_v32  ;;  %v746_v38 = vsel %vm713_vm9, %v675_v15, %v730_v31 }
 0x28c   : > { %v749_v36 = vsel %vm716_vm10, %v686_v27, %v733_v33 }
 0x28d   : > { %v1405_v37 = vpop.f32.mrb[12].mxu1  ;;  %v747_v39 = vsel %vm714_vm11, %v678_v32, %v731_v34  ;;  %v759_v40 = vpack.c.bf16 %v749_v36, %v748_v35 }
 0x28e   : > { %v699_v41 = vadd.f32 %v1405_v37, %v2136_v10  ;;  %v690_v42 = vpop.f32.mrb[13].mxu1  ;;  %v758_v43 = vpack.c.bf16 %v747_v39, %v746_v38 }
 0x28f   : > { %v691_v44 = vadd.f32 %v2136_v10, %v690_v42  ;;  %v1406_v45 = vpop.f32.mrb[14].mxu1 }
 0x290   : > { %v736_v46 = vmul.f32 %v2138_v16, %v699_v41  ;;  %v702_v47 = vadd.f32 %v1406_v45, %v2136_v10  ;;  %v693_v48 = vpop.f32.mrb[15].mxu1  ;;  %1431 = vmatprep.mubr.bf16.mxu0 %v758_v43  ;;  %vm719_vm12 = vcmp.ge.f32.partialorder %v699_v41, 0.0  ;;  %v2182_v43 = vld [vmem:[%s2308_s5] ss:$0 sm:$0xff] }
 0x291   : > { %v734_v49 = vmul.f32 %v2138_v16, %v691_v44  ;;  %v694_v50 = vadd.f32 %v2136_v10, %v693_v48  ;;  %1432 = vmatmul.mubr.bf16.gmra.mrb[24].mxu0 %v759_v40  ;;  %vm717_vm13 = vcmp.ge.f32.partialorder %v691_v44, 0.0 }
 0x292   : > { %vm720_vm14 = vcmp.ge.f32.partialorder %v702_v47, 0.0  ;;  %v737_v51 = vmul.f32 %v2138_v16, %v702_v47  ;;  %v752_v53 = vsel %vm719_vm12, %v699_v41, %v736_v46 }
 0x293   : > { %vm718_vm15 = vcmp.ge.f32.partialorder %v694_v50, 0.0  ;;  %v735_v52 = vmul.f32 %v2138_v16, %v694_v50  ;;  %v750_v55 = vsel %vm717_vm13, %v691_v44, %v734_v49 }
 0x294   : > { %v753_v54 = vsel %vm720_vm14, %v702_v47, %v737_v51 }
 0x295   : > { %v751_v56 = vsel %vm718_vm15, %v694_v50, %v735_v52  ;;  %v761_v57 = vpack.c.bf16 %v753_v54, %v752_v53 }
 0x296   : > { %v760_v58 = vpack.c.bf16 %v751_v56, %v750_v55 }
 0x298   : > { %1435 = vmatprep.mubr.bf16.mxu0 %v760_v58 }
 0x299   : > { %1436 = vmatmul.mubr.bf16.gmra.mrb[28].mxu0 %v761_v57 }
 0x354   : > { %v1425_v59 = vpop.f32.mrb[16].mxu0 }
 0x355   : > { %v860_v60 = vpop.f32.mrb[17].mxu0 }
 0x356   : > { %v1426_v61 = vpop.f32.mrb[18].mxu0 }
 0x357   : > { %v924_v10 = vpack.c.bf16 %v1426_v61, %v1425_v59  ;;  %v863_v7 = vpop.f32.mrb[19].mxu0 }
 0x358   : > { %v923_v8 = vpack.c.bf16 %v863_v7, %v860_v60 }
 0x35a   : > { %1439 = vmatprep.subr.bf16.mxu1 %v923_v8 }
 0x35b   : > { %1440 = vmatpush3.bf16.msra.mxu1 %v923_v8 }
 0x35c   : > { %v1429_v9 = vpop.f32.mrb[20].mxu0  ;;  %1441 = vmatprep.subr.bf16.mxu1 %v924_v10 }
 0x35d   : > { %v876_v15 = vpop.f32.mrb[21].mxu0 }
 0x35e   : > { %v1430_v21 = vpop.f32.mrb[22].mxu0 }
 0x35f   : > { %v926_v22 = vpack.c.bf16 %v1430_v21, %v1429_v9  ;;  %v879_v27 = vpop.f32.mrb[23].mxu0  ;;  %1442 = vmatpush3.bf16.msra.mxu1 %v924_v10 }
 0x360   : > { %v925_v28 = vpack.c.bf16 %v879_v27, %v876_v15 }
 0x362   : > { %1443 = vmatprep.subr.bf16.mxu1 %v925_v28 }
 0x363   : > { %1444 = vmatpush3.bf16.msra.mxu1 %v925_v28 }
 0x364   : > { %v1433_v31 = vpop.f32.mrb[24].mxu0  ;;  %1445 = vmatprep.subr.bf16.mxu1 %v926_v22 }
 0x365   : > { %v892_v32 = vpop.f32.mrb[25].mxu0 }
 0x366   : > { %v1434_v33 = vpop.f32.mrb[26].mxu0 }
 0x367   : > { %v928_v34 = vpack.c.bf16 %v1434_v33, %v1433_v31  ;;  %v895_v35 = vpop.f32.mrb[27].mxu0  ;;  %1446 = vmatpush3.bf16.msra.mxu1 %v926_v22 }
 0x368   : > { %v927_v36 = vpack.c.bf16 %v895_v35, %v892_v32 }
 0x36a   : > { %1447 = vmatprep.subr.bf16.mxu1 %v927_v36 }
 0x36b   : > { %1448 = vmatpush3.bf16.msra.mxu1 %v927_v36 }
 0x36c   : > { %v1437_v37 = vpop.f32.mrb[28].mxu0  ;;  %1449 = vmatprep.subr.bf16.mxu1 %v928_v34 }
 0x36d   : > { %v908_v38 = vpop.f32.mrb[29].mxu0 }
 0x36e   : > { %v1438_v39 = vpop.f32.mrb[30].mxu0 }
 0x36f   : > { %v930_v40 = vpack.c.bf16 %v1438_v39, %v1437_v37  ;;  %v911_v41 = vpop.f32.mrb[31].mxu0  ;;  %1450 = vmatpush3.bf16.msra.mxu1 %v928_v34 }
 0x370   : > { %v929_v42 = vpack.c.bf16 %v911_v41, %v908_v38 }
 0x372   : > { %1451 = vmatprep.subr.bf16.mxu1 %v929_v42 }
 0x373   : > { %1452 = vmatpush3.bf16.msra.mxu1 %v929_v42 }
 0x374   : > { %1453 = vmatprep.subr.bf16.mxu1 %v930_v40 }
 0x377   : > { %1454 = vmatpush3.bf16.msra.mxu1 %v930_v40 }
 0x37a   : > { %1456 = vmatmul.mubr.bf16.vlgmr.msra.gmra.mrb[16].mxu1 %v2111_v62 }
 0x37b   : > { %1459 = vmatprep.mubr.bf16.mxu1 %v2113_v63 }
 0x382   : > { %1460 = vmatmul.mubr.bf16.gmra.mrb[20].mxu1 %v2117_v0 }
 0x383   : > { %1463 = vmatprep.mubr.bf16.mxu1 %v2119_v1 }
 0x38a   : > { %1464 = vmatmul.mubr.bf16.gmra.mrb[24].mxu1 %v2123_v2 }
 0x38b   : > { %1467 = vmatprep.mubr.bf16.mxu1 %v2125_v3 }
 0x392   : > { %1468 = vmatmul.mubr.bf16.gmra.mrb[28].mxu1 %v2129_v6 }
 0x44d   : > { %v1457_v44 = vpop.f32.mrb[16].mxu1 }
 0x44e   : > { %v981_v62 = vadd.f32 %v1457_v44, %v2182_v43  ;;  %v972_v45 = vpop.f32.mrb[17].mxu1 }
 0x44f   : > { %v973_v63 = vadd.f32 %v2182_v43, %v972_v45  ;;  %v1458_v0 = vpop.f32.mrb[18].mxu1 }
 0x450   : > { %v1037_v1 = vadd.f32 %v981_v62, %v2053_v11  ;;  %v984_v2 = vadd.f32 %v1458_v0, %v2182_v43  ;;  %v975_v3 = vpop.f32.mrb[19].mxu1 }
 0x451   : > { %v1035_v6 = vadd.f32 %v973_v63, %v2045_v4  ;;  %v976_v46 = vadd.f32 %v2182_v43, %v975_v3 }
 0x452   : > { %vm1053_vm0 = vcmp.ge.f32.partialorder %v1037_v1, 0.0  ;;  %v1069_v47 = vmul.f32 %v1037_v1, %v2138_v16  ;;  %v1038_v48 = vadd.f32 %v984_v2, %v2056_v12 }
 0x453   : > { %vm1051_vm1 = vcmp.ge.f32.partialorder %v1035_v6, 0.0  ;;  %v1067_v49 = vmul.f32 %v1035_v6, %v2138_v16  ;;  %v1036_v50 = vadd.f32 %v976_v46, %v2048_v5 }
 0x454   : > { %v1085_v51 = vsel %vm1053_vm0, %v1037_v1, %v1069_v47  ;;  %vm1054_vm2 = vcmp.ge.f32.partialorder %v1038_v48, 0.0  ;;  %v1070_v11 = vmul.f32 %v1038_v48, %v2138_v16 }
 0x455   : > { %1101 = vst [vmem:[%s2197_s15 + $0x10] sm:$0xff] %v1085_v51  ;;  %v1083_v4 = vsel %vm1051_vm1, %v1035_v6, %v1067_v49  ;;  %vm1052_vm3 = vcmp.ge.f32.partialorder %v1036_v50, 0.0  ;;  %v1068_v12 = vmul.f32 %v1036_v50, %v2138_v16  ;;  %v1461_v52 = vpop.f32.mrb[20].mxu1 }
 0x456   : > { %1099 = vst [vmem:[%s2197_s15] sm:$0xff] %v1083_v4  ;;  %v1086_v53 = vsel %vm1054_vm2, %v1038_v48, %v1070_v11  ;;  %v997_v5 = vadd.f32 %v1461_v52, %v2182_v43  ;;  %v988_v54 = vpop.f32.mrb[21].mxu1 }
 0x457   : > { %1102 = vst [vmem:[%s2197_s15 + $0x18] sm:$0xff] %v1086_v53  ;;  %v1084_v55 = vsel %vm1052_vm3, %v1036_v50, %v1068_v12  ;;  %v989_v56 = vadd.f32 %v2182_v43, %v988_v54  ;;  %v1462_v57 = vpop.f32.mrb[22].mxu1 }
 0x458   : > { %1100 = vst [vmem:[%s2197_s15 + $0x8] sm:$0xff] %v1084_v55  ;;  %v1041_v58 = vadd.f32 %v997_v5, %v2069_v17  ;;  %v1000_v59 = vadd.f32 %v1462_v57, %v2182_v43  ;;  %v991_v60 = vpop.f32.mrb[23].mxu1 }
 0x459   : > { %v1039_v61 = vadd.f32 %v989_v56, %v2059_v13  ;;  %v992_v10 = vadd.f32 %v2182_v43, %v991_v60 }
 0x45a   : > { %vm1057_vm4 = vcmp.ge.f32.partialorder %v1041_v58, 0.0  ;;  %v1073_v7 = vmul.f32 %v1041_v58, %v2138_v16  ;;  %v1042_v8 = vadd.f32 %v1000_v59, %v2072_v18 }
 0x45b   : > { %vm1055_vm5 = vcmp.ge.f32.partialorder %v1039_v61, 0.0  ;;  %v1071_v9 = vmul.f32 %v1039_v61, %v2138_v16  ;;  %v1040_v15 = vadd.f32 %v992_v10, %v2062_v14 }
 0x45c   : > { %v1089_v17 = vsel %vm1057_vm4, %v1041_v58, %v1073_v7  ;;  %vm1058_vm6 = vcmp.ge.f32.partialorder %v1042_v8, 0.0  ;;  %v1074_v21 = vmul.f32 %v1042_v8, %v2138_v16 }
 0x45d   : > { %1105 = vst [vmem:[%s2197_s15 + $0x30] sm:$0xff] %v1089_v17  ;;  %v1087_v13 = vsel %vm1055_vm5, %v1039_v61, %v1071_v9  ;;  %vm1056_vm7 = vcmp.ge.f32.partialorder %v1040_v15, 0.0  ;;  %v1072_v22 = vmul.f32 %v1040_v15, %v2138_v16  ;;  %v1465_v27 = vpop.f32.mrb[24].mxu1 }
 0x45e   : > { %1103 = vst [vmem:[%s2197_s15 + $0x20] sm:$0xff] %v1087_v13  ;;  %v1090_v28 = vsel %vm1058_vm6, %v1042_v8, %v1074_v21  ;;  %v1013_v18 = vadd.f32 %v1465_v27, %v2182_v43  ;;  %v1004_v31 = vpop.f32.mrb[25].mxu1 }
 0x45f   : > { %1106 = vst [vmem:[%s2197_s15 + $0x38] sm:$0xff] %v1090_v28  ;;  %v1088_v32 = vsel %vm1056_vm7, %v1040_v15, %v1072_v22  ;;  %v1005_v14 = vadd.f32 %v2182_v43, %v1004_v31  ;;  %v1466_v33 = vpop.f32.mrb[26].mxu1 }
 0x460   : > { %1104 = vst [vmem:[%s2197_s15 + $0x28] sm:$0xff] %v1088_v32  ;;  %v1045_v34 = vadd.f32 %v1013_v18, %v2085_v23  ;;  %v1016_v35 = vadd.f32 %v1466_v33, %v2182_v43  ;;  %v1007_v36 = vpop.f32.mrb[27].mxu1 }
 0x461   : > { %v1043_v37 = vadd.f32 %v1005_v14, %v2075_v19  ;;  %v1008_v38 = vadd.f32 %v2182_v43, %v1007_v36 }
 0x462   : > { %vm1061_vm8 = vcmp.ge.f32.partialorder %v1045_v34, 0.0  ;;  %v1077_v39 = vmul.f32 %v1045_v34, %v2138_v16  ;;  %v1046_v40 = vadd.f32 %v1016_v35, %v2088_v24 }
 0x463   : > { %vm1059_vm9 = vcmp.ge.f32.partialorder %v1043_v37, 0.0  ;;  %v1075_v41 = vmul.f32 %v1043_v37, %v2138_v16  ;;  %v1044_v42 = vadd.f32 %v1008_v38, %v2078_v20 }
 0x464   : > { %v1093_v23 = vsel %vm1061_vm8, %v1045_v34, %v1077_v39  ;;  %vm1062_vm10 = vcmp.ge.f32.partialorder %v1046_v40, 0.0  ;;  %v1078_v44 = vmul.f32 %v1046_v40, %v2138_v16 }
 0x465   : > { %1109 = vst [vmem:[%s2197_s15 + $0x50] sm:$0xff] %v1093_v23  ;;  %v1091_v19 = vsel %vm1059_vm9, %v1043_v37, %v1075_v41  ;;  %vm1060_vm11 = vcmp.ge.f32.partialorder %v1044_v42, 0.0  ;;  %v1076_v62 = vmul.f32 %v1044_v42, %v2138_v16  ;;  %v1469_v45 = vpop.f32.mrb[28].mxu1 }
 0x466   : > { %1107 = vst [vmem:[%s2197_s15 + $0x40] sm:$0xff] %v1091_v19  ;;  %v1094_v63 = vsel %vm1062_vm10, %v1046_v40, %v1078_v44  ;;  %v1029_v24 = vadd.f32 %v1469_v45, %v2182_v43  ;;  %v1020_v0 = vpop.f32.mrb[29].mxu1 }
 0x467   : > { %1110 = vst [vmem:[%s2197_s15 + $0x58] sm:$0xff] %v1094_v63  ;;  %v1092_v20 = vsel %vm1060_vm11, %v1044_v42, %v1076_v62  ;;  %v1021_v1 = vadd.f32 %v2182_v43, %v1020_v0  ;;  %v1470_v2 = vpop.f32.mrb[30].mxu1 }
 0x468   : > { %1108 = vst [vmem:[%s2197_s15 + $0x48] sm:$0xff] %v1092_v20  ;;  %v1049_v3 = vadd.f32 %v1029_v24, %v2101_v29  ;;  %v1032_v6 = vadd.f32 %v1470_v2, %v2182_v43  ;;  %v1023_v46 = vpop.f32.mrb[31].mxu1 }
 0x469   : > { %v1047_v47 = vadd.f32 %v1021_v1, %v2091_v25  ;;  %v1024_v48 = vadd.f32 %v2182_v43, %v1023_v46 }
 0x46a   : > { %vm1065_vm12 = vcmp.ge.f32.partialorder %v1049_v3, 0.0  ;;  %v1081_v49 = vmul.f32 %v1049_v3, %v2138_v16  ;;  %v1050_v50 = vadd.f32 %v1032_v6, %v2104_v30 }
 0x46b   : > { %vm1063_vm13 = vcmp.ge.f32.partialorder %v1047_v47, 0.0  ;;  %v1079_v29 = vmul.f32 %v1047_v47, %v2138_v16  ;;  %v1048_v51 = vadd.f32 %v1024_v48, %v2094_v26 }
 0x46c   : > { %v1097_v11 = vsel %vm1065_vm12, %v1049_v3, %v1081_v49  ;;  %vm1066_vm14 = vcmp.ge.f32.partialorder %v1050_v50, 0.0  ;;  %v1082_v25 = vmul.f32 %v1050_v50, %v2138_v16 }
 0x46d   : > { %1113 = vst [vmem:[%s2197_s15 + $0x70] sm:$0xff] %v1097_v11  ;;  %v1095_v43 = vsel %vm1063_vm13, %v1047_v47, %v1079_v29  ;;  %vm1064_vm15 = vcmp.ge.f32.partialorder %v1048_v51, 0.0  ;;  %v1080_v30 = vmul.f32 %v1048_v51, %v2138_v16 }
 0x46e   : > { %1111 = vst [vmem:[%s2197_s15 + $0x60] sm:$0xff] %v1095_v43  ;;  %v1098_v26 = vsel %vm1066_vm14, %v1050_v50, %v1082_v25 }
 0x46f   : > { %1114 = vst [vmem:[%s2197_s15 + $0x78] sm:$0xff] %v1098_v26  ;;  %v1096_v4 = vsel %vm1064_vm15, %v1048_v51, %v1080_v30 }
 0x470   : > { %1112 = vst [vmem:[%s2197_s15 + $0x68] sm:$0xff] %v1096_v4 }
 0x471   : > { %1705 = shalt.err (!%p1702_p4)
}
 0x472   : > { %s1706_s10 = scalar_lea.hbm %s2254_s16, 2048  ;;  %s1710_s12 = scalar_lea.hbm %s2310_s7, 4096 }
 0x473   : > { %p1707_p9 = scmp.ne.s32.totalorder %s2254_s16, %s1706_s10  ;;  %p1711_p8 = scmp.lt.u32.totalorder %s2254_s16, %s2310_s7 }
 0x474   : > { %p1712_p13 = scmp.lt.u32.totalorder %s1710_s12, %s1706_s10  ;;  %p1714_p10 = scmp.lt.u32.totalorder %s1706_s10, %s2254_s16 }
 0x475   : > { %p1708_p0 = pnand %p1707_p9, %p1976_p5 }
 0x476   : > { %p1713_p6 = por %p1712_p13, %p1711_p8 }
 0x477   : > { %p1709_p11 = pneg %p1708_p0 }
 0x478   : > { %p1715_p3 = por %p1714_p10, %p1713_p6 }
 0x47a   : > { %p1716_p7 = pnand %p1715_p3, %p1709_p11 }
 0x47c   : > { %1719 = shalt.err (!%p1716_p7)
}
 0x47d   : > { %s1777_s6 = smov 128   ;;  %s1778_s13 = smov 8  }
 0x47e   : > { %1485 = dma.vmem_to_hbm [thread:$0]  (%p1976_p5), %s2256_s25, 2048, %s2254_s16, %s1116_s18, %s1777_s6, %s1777_s6, %s1778_s13  }
 0x47f PF: > { %s1144_s17 = sand.u32 1, %s1754_s26   ;;  %p2328_p12 = scmp.ne.s32.totalorder %s2315_s9, 0 }
 0x480   : > { %p2329_p1 = scmp.ge.s32.totalorder %s1766_s29, 2  ;;  %s1145_s11 = scalar_lea.sflag [#allocation5], %s1144_s17 }
 0x482   : > { %p1502_p2 = pnand %p2329_p1, %p2328_p12 }
 0x484   : > { %1749 = dma.done.wait (!%p1502_p2), %s1145_s11, 2048  }
 0x485   : > { %1751 = vsyncadd (!%p1502_p2), %s1145_s11, 4294965248  ;;  %p23_p4 = scmp.ge.s32.totalorder %s1962_s23, 4   ;;  %s2330_s26 = smov %s1758_s27 }
 0x486   : > { %s2331_s27 = smov %s1762_s28  ;;  %s2332_s28 = smov %s1972_s19 }
 0x487   : > { %s2333_s29 = smov %s1962_s23  ;;  %25 = sbr.rel (!%p23_p4) target bundleno = 9 (0x9), region = 105 }
 0x48e   :  { %1150 = vsyncpa [#allocation4], 1 }
 0x48f   :  { %1152 = vsyncpa [#allocation4 + $0x1], 1 }
 0x490   :  { %1153 = vsyncpa [#allocation7], 1 }
 0x491   :  { %1154 = vsyncpa [#allocation10], 1 }
 0x492   :  { %1155 = vsyncpa [#allocation5], 1 }
 0x493   :  { %1157 = vsyncpa [#allocation5 + $0x1], 1 }

</bundles_post_ra>
